<compile_context>
chip_gen: v6e
topology: v6e:2x2x1
jax: 0.10.0
libtpu: 0.0.40
codegen_flags: <defaults>
</compile_context>

<pallas_src>
import math

import jax
import jax.numpy as jnp
import numpy as np
from jax import lax
from jax.experimental import pallas as pl
from jax.experimental.pallas import tpu as pltpu


def _make_mha_kernel(block_b, t, e, heads):
    he = heads * e

    def kernel(x_ref, wqkv_ref, wu_ref, b_ref, o_ref):
        # x_ref:    (block_b*t, e)    current batch tile (pipelined)
        # wqkv_ref: (e, 3*heads*e)    [Wq~ | Wk~ | Wv]  (q/k pre-scaled), resident
        # wu_ref:   (heads*e, e)      unify_heads weight (transposed), resident
        # b_ref:    (1, e)            unify_heads bias, resident
        # o_ref:    (block_b*t, e)
        x = x_ref[...].astype(jnp.float32)

        # Fused Q/K/V projection: one wide, MXU-friendly matmul (N = 3*heads*e).
        qkv = jnp.dot(x, wqkv_ref[...], preferred_element_type=jnp.float32)
        q_all = qkv[:, 0 * he:1 * he]
        k_all = qkv[:, 1 * he:2 * he]
        v_all = qkv[:, 2 * he:3 * he]

        # Per-(batch-row, head) softmax attention.  block_b and heads are small
        # static ints, so the Python loops fully unroll.
        row_blocks = []
        for bi in range(block_b):
            r0 = bi * t
            head_outs = []
            for h in range(heads):
                c0 = h * e
                q_h = q_all[r0:r0 + t, c0:c0 + e]            # (t, e)
                k_h = k_all[r0:r0 + t, c0:c0 + e]            # (t, e)
                v_h = v_all[r0:r0 + t, c0:c0 + e]            # (t, e)
                logits = lax.dot_general(                    # q_h @ k_h.T -> (t, t)
                    q_h, k_h, (((1,), (1,)), ((), ())),
                    preferred_element_type=jnp.float32)
                logits = logits - jnp.max(logits, axis=-1, keepdims=True)
                p = jnp.exp(logits)                          # f32 softmax
                denom = jnp.sum(p, axis=-1, keepdims=True)
                p = p * pl.reciprocal(denom, approx=True)    # EUP slot, ~free
                head_outs.append(
                    jnp.dot(p, v_h, preferred_element_type=jnp.float32))  # (t, e)
            row_blocks.append(jnp.concatenate(head_outs, axis=-1))        # (t, he)
        attn = row_blocks[0] if block_b == 1 else jnp.concatenate(row_blocks, axis=0)

        # Fused unify_heads projection (K = heads*e) + bias.
        out = jnp.dot(attn, wu_ref[...], preferred_element_type=jnp.float32)
        out = out + b_ref[...]                               # (1, e) broadcast
        o_ref[...] = out.astype(o_ref.dtype)

    return kernel


def multi_head_attention(x, wq, wk, wv, wu, bu, heads, *, block_b=1):
    """x: (b, t, e).  wq/wk/wv: (heads*e, e) PyTorch Linear weights (out, in).
    wu: (e, heads*e), bu: (e,).  Returns (b, t, e)."""
    b, t, e = x.shape
    he = heads * e
    assert wq.shape == (he, e) and wk.shape == (he, e) and wv.shape == (he, e)
    assert wu.shape == (e, he) and bu.shape == (e,)
    assert b % block_b == 0, "block_b must divide the batch size"

    # Fold the 1/e**(1/4) query/key scaling into the projection weights and fuse
    # [Wq | Wk | Wv] column-wise so the kernel does a single (e, 3*he) matmul.
    scale = 1.0 / (float(e) ** 0.25)
    wqkv = jnp.concatenate(
        [wq.T * scale, wk.T * scale, wv.T], axis=1).astype(jnp.float32)   # (e, 3*he)
    wu_t = wu.T.astype(jnp.float32)                                       # (he, e)
    bias = bu.reshape(1, e).astype(jnp.float32)

    # Flatten (b, t, e) -> (b*t, e): free layout change, lets the kernel work on
    # plain 2-D tiles (no in-kernel reshape, sublane dim = block_b*t).
    x2 = x.reshape(b * t, e)
    rows_per_block = block_b * t

    grid = (b // block_b,)
    kernel = _make_mha_kernel(block_b, t, e, heads)

    out2 = pl.pallas_call(
        kernel,
        out_shape=jax.ShapeDtypeStruct((b * t, e), x.dtype),
        grid_spec=pltpu.PrefetchScalarGridSpec(
            num_scalar_prefetch=0,
            grid=grid,
            in_specs=[
                pl.BlockSpec((rows_per_block, e), lambda i: (i, 0)),  # x (pipelined)
                # Constant index maps: weights/bias are DMA'd once and stay
                # VMEM-resident across all batch-tile steps.
                pl.BlockSpec((e, 3 * he), lambda i: (0, 0)),          # fused Wqkv
                pl.BlockSpec((he, e), lambda i: (0, 0)),              # Wu^T
                pl.BlockSpec((1, e), lambda i: (0, 0)),               # bias
            ],
            out_specs=pl.BlockSpec((rows_per_block, e), lambda i: (i, 0)),
        ),
        compiler_params=pltpu.CompilerParams(
            dimension_semantics=("parallel",),
            # NOTE: for large block_b / t / e, raise vmem_limit_bytes here so
            # bigger blocks + resident weights fit the scoped VMEM budget.
        ),
    )(x2, wqkv, wu_t, bias)

    return out2.reshape(b, t, e)


def multi_head_attention_ref(x, wq, wk, wv, wu, bu, heads):
    """Pure-JAX reference mirroring the PyTorch forward exactly."""
    b, t, e = x.shape
    keys = (x @ wk.T).reshape(b, t, heads, e).transpose(0, 2, 1, 3).reshape(b * heads, t, e)
    queries = (x @ wq.T).reshape(b, t, heads, e).transpose(0, 2, 1, 3).reshape(b * heads, t, e)
    values = (x @ wv.T).reshape(b, t, heads, e).transpose(0, 2, 1, 3).reshape(b * heads, t, e)
    queries = queries / e ** (1 / 4)
    keys = keys / e ** (1 / 4)
    dot = jnp.einsum("bte,bse->bts", queries, keys)
    dot = jax.nn.softmax(dot, axis=2)
    out = jnp.einsum("bts,bse->bte", dot, values).reshape(b, heads, t, e)
    out = out.transpose(0, 2, 1, 3).reshape(b, t, heads * e)
    return out @ wu.T + bu


if __name__ == "__main__":
    # Small shapes consistent with the module: b=2, t=8 (seq), e=32 (emb), heads=4.
    b, t, e, heads = 2, 8, 32, 4

    key = jax.random.PRNGKey(0)
    kx, kq, kk, kv, ku, kb = jax.random.split(key, 6)

    x = jax.random.normal(kx, (b, t, e), dtype=jnp.float32)

    # Deterministic parameter init (matches nn.Linear shapes: weight (out, in)).
    bound_qkv = 1.0 / math.sqrt(e)
    bound_u = 1.0 / math.sqrt(heads * e)
    wq = jax.random.uniform(kq, (heads * e, e), jnp.float32, -bound_qkv, bound_qkv)
    wk = jax.random.uniform(kk, (heads * e, e), jnp.float32, -bound_qkv, bound_qkv)
    wv = jax.random.uniform(kv, (heads * e, e), jnp.float32, -bound_qkv, bound_qkv)
    wu = jax.random.uniform(ku, (e, heads * e), jnp.float32, -bound_u, bound_u)
    bu = jax.random.uniform(kb, (e,), jnp.float32, -bound_u, bound_u)

    out = multi_head_attention(x, wq, wk, wv, wu, bu, heads)
    out = jax.block_until_ready(out)

    ref = multi_head_attention_ref(x, wq, wk, wv, wu, bu, heads)
    # Tolerance loosened from 2e-5 because the softmax denominator uses the EUP
    # approximate reciprocal (~2^-12 relative error -> ~1e-4-level output error).
    np.testing.assert_allclose(np.asarray(out), np.asarray(ref), atol=2e-3, rtol=2e-3)

    print("KERNEL_OK")
</pallas_src>

<mosaic_0001>
module attributes {stable_mosaic.version = 11 : i64} {
  func.func @kernel(%arg0: i32, %arg1: memref<8x32xf32, #tpu.memory_space<vmem>>, %arg2: memref<32x384xf32, #tpu.memory_space<vmem>>, %arg3: memref<128x32xf32, #tpu.memory_space<vmem>>, %arg4: memref<1x32xf32, #tpu.memory_space<vmem>>, %arg5: memref<8x32xf32, #tpu.memory_space<vmem>>) attributes {dimension_semantics = [#tpu.dimension_semantics<parallel>], iteration_bounds = array<i64: 2>, scalar_prefetch = 0 : i64, scratch_operands = 0 : i64, tpu.core_type = #tpu.core_type<tc>, window_params = [{transform_indices = @transform_0, window_bounds = array<i64: 8, 32>}, {pipeline_mode = #tpu.pipeline_mode<synchronous>, transform_indices = @transform_1, window_bounds = array<i64: 32, 384>}, {pipeline_mode = #tpu.pipeline_mode<synchronous>, transform_indices = @transform_2, window_bounds = array<i64: 128, 32>}, {pipeline_mode = #tpu.pipeline_mode<synchronous>, transform_indices = @transform_3, window_bounds = array<i64: 1, 32>}, {transform_indices = @transform_4, window_bounds = array<i64: 8, 32>}]} {
    %c0 = arith.constant 0 : index
    %c0_0 = arith.constant 0 : index
    %0 = vector.load %arg1[%c0, %c0_0] : memref<8x32xf32, #tpu.memory_space<vmem>>, vector<8x32xf32>
    %c0_1 = arith.constant 0 : index
    %c0_2 = arith.constant 0 : index
    %1 = vector.load %arg2[%c0_1, %c0_2] : memref<32x384xf32, #tpu.memory_space<vmem>>, vector<32x384xf32>
    %cst = arith.constant dense<0.000000e+00> : vector<8x384xf32>
    %2 = tpu.matmul %0, %1, %cst {dimension_numbers = #tpu.dot_dimension_numbers<[1], [0], [0], [1], [0, 0, 1, 1], [], []>} : vector<8x32xf32>, vector<32x384xf32>, vector<8x384xf32> -> vector<8x384xf32>
    %3 = vector.extract_strided_slice %2 {offsets = [0, 0], sizes = [8, 128], strides = [1, 1]} : vector<8x384xf32> to vector<8x128xf32>
    %4 = vector.extract_strided_slice %2 {offsets = [0, 128], sizes = [8, 128], strides = [1, 1]} : vector<8x384xf32> to vector<8x128xf32>
    %5 = vector.extract_strided_slice %2 {offsets = [0, 256], sizes = [8, 128], strides = [1, 1]} : vector<8x384xf32> to vector<8x128xf32>
    %6 = vector.extract_strided_slice %3 {offsets = [0, 0], sizes = [8, 32], strides = [1, 1]} : vector<8x128xf32> to vector<8x32xf32>
    %7 = vector.extract_strided_slice %4 {offsets = [0, 0], sizes = [8, 32], strides = [1, 1]} : vector<8x128xf32> to vector<8x32xf32>
    %8 = vector.extract_strided_slice %5 {offsets = [0, 0], sizes = [8, 32], strides = [1, 1]} : vector<8x128xf32> to vector<8x32xf32>
    %cst_3 = arith.constant dense<0.000000e+00> : vector<8x8xf32>
    %9 = tpu.matmul %6, %7, %cst_3 {dimension_numbers = #tpu.dot_dimension_numbers<[1], [1], [0], [0], [0, 0, 1, 0], [], []>} : vector<8x32xf32>, vector<8x32xf32>, vector<8x8xf32> -> vector<8x8xf32>
    %cst_4 = arith.constant dense<0xFF800000> : vector<8xf32>
    %10 = vector.multi_reduction <maximumf>, %9, %cst_4 [1] : vector<8x8xf32> to vector<8xf32>
    %11 = vector.shape_cast %10 : vector<8xf32> to vector<8x1xf32>
    %12 = vector.broadcast %11 : vector<8x1xf32> to vector<8x8xf32>
    %13 = arith.subf %9, %12 : vector<8x8xf32>
    %14 = math.exp %13 : vector<8x8xf32>
    %cst_5 = arith.constant dense<0.000000e+00> : vector<8xf32>
    %15 = vector.multi_reduction <add>, %14, %cst_5 [1] : vector<8x8xf32> to vector<8xf32>
    %16 = vector.shape_cast %15 : vector<8xf32> to vector<8x1xf32>
    %17 = tpu.reciprocal %16 {approx = true} : vector<8x1xf32> -> vector<8x1xf32>
    %18 = vector.broadcast %17 : vector<8x1xf32> to vector<8x8xf32>
    %19 = arith.mulf %14, %18 : vector<8x8xf32>
    %cst_6 = arith.constant dense<0.000000e+00> : vector<8x32xf32>
    %20 = tpu.matmul %19, %8, %cst_6 {dimension_numbers = #tpu.dot_dimension_numbers<[1], [0], [0], [1], [0, 0, 1, 1], [], []>} : vector<8x8xf32>, vector<8x32xf32>, vector<8x32xf32> -> vector<8x32xf32>
    %21 = vector.extract_strided_slice %3 {offsets = [0, 32], sizes = [8, 32], strides = [1, 1]} : vector<8x128xf32> to vector<8x32xf32>
    %22 = vector.extract_strided_slice %4 {offsets = [0, 32], sizes = [8, 32], strides = [1, 1]} : vector<8x128xf32> to vector<8x32xf32>
    %23 = vector.extract_strided_slice %5 {offsets = [0, 32], sizes = [8, 32], strides = [1, 1]} : vector<8x128xf32> to vector<8x32xf32>
    %cst_7 = arith.constant dense<0.000000e+00> : vector<8x8xf32>
    %24 = tpu.matmul %21, %22, %cst_7 {dimension_numbers = #tpu.dot_dimension_numbers<[1], [1], [0], [0], [0, 0, 1, 0], [], []>} : vector<8x32xf32>, vector<8x32xf32>, vector<8x8xf32> -> vector<8x8xf32>
    %cst_8 = arith.constant dense<0xFF800000> : vector<8xf32>
    %25 = vector.multi_reduction <maximumf>, %24, %cst_8 [1] : vector<8x8xf32> to vector<8xf32>
    %26 = vector.shape_cast %25 : vector<8xf32> to vector<8x1xf32>
    %27 = vector.broadcast %26 : vector<8x1xf32> to vector<8x8xf32>
    %28 = arith.subf %24, %27 : vector<8x8xf32>
    %29 = math.exp %28 : vector<8x8xf32>
    %cst_9 = arith.constant dense<0.000000e+00> : vector<8xf32>
    %30 = vector.multi_reduction <add>, %29, %cst_9 [1] : vector<8x8xf32> to vector<8xf32>
    %31 = vector.shape_cast %30 : vector<8xf32> to vector<8x1xf32>
    %32 = tpu.reciprocal %31 {approx = true} : vector<8x1xf32> -> vector<8x1xf32>
    %33 = vector.broadcast %32 : vector<8x1xf32> to vector<8x8xf32>
    %34 = arith.mulf %29, %33 : vector<8x8xf32>
    %cst_10 = arith.constant dense<0.000000e+00> : vector<8x32xf32>
    %35 = tpu.matmul %34, %23, %cst_10 {dimension_numbers = #tpu.dot_dimension_numbers<[1], [0], [0], [1], [0, 0, 1, 1], [], []>} : vector<8x8xf32>, vector<8x32xf32>, vector<8x32xf32> -> vector<8x32xf32>
    %36 = vector.extract_strided_slice %3 {offsets = [0, 64], sizes = [8, 32], strides = [1, 1]} : vector<8x128xf32> to vector<8x32xf32>
    %37 = vector.extract_strided_slice %4 {offsets = [0, 64], sizes = [8, 32], strides = [1, 1]} : vector<8x128xf32> to vector<8x32xf32>
    %38 = vector.extract_strided_slice %5 {offsets = [0, 64], sizes = [8, 32], strides = [1, 1]} : vector<8x128xf32> to vector<8x32xf32>
    %cst_11 = arith.constant dense<0.000000e+00> : vector<8x8xf32>
    %39 = tpu.matmul %36, %37, %cst_11 {dimension_numbers = #tpu.dot_dimension_numbers<[1], [1], [0], [0], [0, 0, 1, 0], [], []>} : vector<8x32xf32>, vector<8x32xf32>, vector<8x8xf32> -> vector<8x8xf32>
    %cst_12 = arith.constant dense<0xFF800000> : vector<8xf32>
    %40 = vector.multi_reduction <maximumf>, %39, %cst_12 [1] : vector<8x8xf32> to vector<8xf32>
    %41 = vector.shape_cast %40 : vector<8xf32> to vector<8x1xf32>
    %42 = vector.broadcast %41 : vector<8x1xf32> to vector<8x8xf32>
    %43 = arith.subf %39, %42 : vector<8x8xf32>
    %44 = math.exp %43 : vector<8x8xf32>
    %cst_13 = arith.constant dense<0.000000e+00> : vector<8xf32>
    %45 = vector.multi_reduction <add>, %44, %cst_13 [1] : vector<8x8xf32> to vector<8xf32>
    %46 = vector.shape_cast %45 : vector<8xf32> to vector<8x1xf32>
    %47 = tpu.reciprocal %46 {approx = true} : vector<8x1xf32> -> vector<8x1xf32>
    %48 = vector.broadcast %47 : vector<8x1xf32> to vector<8x8xf32>
    %49 = arith.mulf %44, %48 : vector<8x8xf32>
    %cst_14 = arith.constant dense<0.000000e+00> : vector<8x32xf32>
    %50 = tpu.matmul %49, %38, %cst_14 {dimension_numbers = #tpu.dot_dimension_numbers<[1], [0], [0], [1], [0, 0, 1, 1], [], []>} : vector<8x8xf32>, vector<8x32xf32>, vector<8x32xf32> -> vector<8x32xf32>
    %51 = vector.extract_strided_slice %3 {offsets = [0, 96], sizes = [8, 32], strides = [1, 1]} : vector<8x128xf32> to vector<8x32xf32>
    %52 = vector.extract_strided_slice %4 {offsets = [0, 96], sizes = [8, 32], strides = [1, 1]} : vector<8x128xf32> to vector<8x32xf32>
    %53 = vector.extract_strided_slice %5 {offsets = [0, 96], sizes = [8, 32], strides = [1, 1]} : vector<8x128xf32> to vector<8x32xf32>
    %cst_15 = arith.constant dense<0.000000e+00> : vector<8x8xf32>
    %54 = tpu.matmul %51, %52, %cst_15 {dimension_numbers = #tpu.dot_dimension_numbers<[1], [1], [0], [0], [0, 0, 1, 0], [], []>} : vector<8x32xf32>, vector<8x32xf32>, vector<8x8xf32> -> vector<8x8xf32>
    %cst_16 = arith.constant dense<0xFF800000> : vector<8xf32>
    %55 = vector.multi_reduction <maximumf>, %54, %cst_16 [1] : vector<8x8xf32> to vector<8xf32>
    %56 = vector.shape_cast %55 : vector<8xf32> to vector<8x1xf32>
    %57 = vector.broadcast %56 : vector<8x1xf32> to vector<8x8xf32>
    %58 = arith.subf %54, %57 : vector<8x8xf32>
    %59 = math.exp %58 : vector<8x8xf32>
    %cst_17 = arith.constant dense<0.000000e+00> : vector<8xf32>
    %60 = vector.multi_reduction <add>, %59, %cst_17 [1] : vector<8x8xf32> to vector<8xf32>
    %61 = vector.shape_cast %60 : vector<8xf32> to vector<8x1xf32>
    %62 = tpu.reciprocal %61 {approx = true} : vector<8x1xf32> -> vector<8x1xf32>
    %63 = vector.broadcast %62 : vector<8x1xf32> to vector<8x8xf32>
    %64 = arith.mulf %59, %63 : vector<8x8xf32>
    %cst_18 = arith.constant dense<0.000000e+00> : vector<8x32xf32>
    %65 = tpu.matmul %64, %53, %cst_18 {dimension_numbers = #tpu.dot_dimension_numbers<[1], [0], [0], [1], [0, 0, 1, 1], [], []>} : vector<8x8xf32>, vector<8x32xf32>, vector<8x32xf32> -> vector<8x32xf32>
    %66 = tpu.concatenate %20, %35, %50, %65 in 1 : vector<8x32xf32>, vector<8x32xf32>, vector<8x32xf32>, vector<8x32xf32> -> vector<8x128xf32>
    %c0_19 = arith.constant 0 : index
    %c0_20 = arith.constant 0 : index
    %67 = vector.load %arg3[%c0_19, %c0_20] : memref<128x32xf32, #tpu.memory_space<vmem>>, vector<128x32xf32>
    %cst_21 = arith.constant dense<0.000000e+00> : vector<8x32xf32>
    %68 = tpu.matmul %66, %67, %cst_21 {dimension_numbers = #tpu.dot_dimension_numbers<[1], [0], [0], [1], [0, 0, 1, 1], [], []>} : vector<8x128xf32>, vector<128x32xf32>, vector<8x32xf32> -> vector<8x32xf32>
    %c0_22 = arith.constant 0 : index
    %c0_23 = arith.constant 0 : index
    %69 = vector.load %arg4[%c0_22, %c0_23] : memref<1x32xf32, #tpu.memory_space<vmem>>, vector<1x32xf32>
    %70 = vector.broadcast %69 : vector<1x32xf32> to vector<8x32xf32>
    %71 = arith.addf %68, %70 : vector<8x32xf32>
    %c0_24 = arith.constant 0 : index
    %c0_25 = arith.constant 0 : index
    %72 = vector.load %arg5[%c0_24, %c0_25] : memref<8x32xf32, #tpu.memory_space<vmem>>, vector<8x32xf32>
    tpu.vector_store %arg5[%c0_24, %c0_25], %71 {strides = array<i32>} : memref<8x32xf32, #tpu.memory_space<vmem>>, vector<8x32xf32>,
    return
  }
  func.func @transform_0(%arg0: i32) -> (i32, i32) {
    %c0_i32 = arith.constant 0 : i32
    %c0_i32_0 = arith.constant 0 : i32
    return %arg0, %c0_i32 : i32, i32
  }
  func.func @transform_1(%arg0: i32) -> (i32, i32) {
    %c0_i32 = arith.constant 0 : i32
    %c0_i32_0 = arith.constant 0 : i32
    %c0_i32_1 = arith.constant 0 : i32
    return %c0_i32, %c0_i32_0 : i32, i32
  }
  func.func @transform_2(%arg0: i32) -> (i32, i32) {
    %c0_i32 = arith.constant 0 : i32
    %c0_i32_0 = arith.constant 0 : i32
    %c0_i32_1 = arith.constant 0 : i32
    return %c0_i32, %c0_i32_0 : i32, i32
  }
  func.func @transform_3(%arg0: i32) -> (i32, i32) {
    %c0_i32 = arith.constant 0 : i32
    %c0_i32_0 = arith.constant 0 : i32
    %c0_i32_1 = arith.constant 0 : i32
    return %c0_i32, %c0_i32_0 : i32, i32
  }
  func.func @transform_4(%arg0: i32) -> (i32, i32) {
    %c0_i32 = arith.constant 0 : i32
    %c0_i32_0 = arith.constant 0 : i32
    return %arg0, %c0_i32 : i32, i32
  }
}

</mosaic_0001>

<bundles_post_ra>
// kernel: tpu_custom_call.1
= control target key start
LH: loop header
LB: loop body
LE: loop exit
PB: predicated region body
PF: predicated region fallthrough
CT: control target
= control target key end

     0   :  { %9 = vsyncpa [#allocation3], 0  ;;  %s1768_s0 = inlined_call_operand.vmem [shape: f32[16,32], index: 0, kind: input, shape index: {}]   ;;  %s1769_s1 = inlined_call_operand.vmem [shape: f32[32,384], index: 1, kind: input, shape index: {}]   ;;  %s1770_s2 = inlined_call_operand.vmem [shape: f32[128,32], index: 2, kind: input, shape index: {}]   ;;  %s1771_s3 = inlined_call_operand.vmem [shape: f32[1,32], index: 3, kind: input, shape index: {}]   ;;  %s1772_s4 = inlined_call_operand.hbm [shape: f32[16,32], index: 4, kind: output, shape index: {}]  }
   0x1   :  { %11 = vsyncpa [#allocation3 + $0x1], 0  ;;  %s1494_s15 = smov 0   ;;  %s1496_s16 = smov 0  }
   0x2   :  { %s1498_s17 = smov 0   ;;  %s1500_s18 = smov 0  }
   0x3 LB: > { %s1515_s19 = sadd.s32 4294967295, %s1461_s18   ;;  %s1192_s20 = sadd.s32 4294967294, %s1461_s18   ;;  %s1461_s18 = sphi %s1500_s18, %s1778_s18   ;;  %s1457_s17 = sphi %s1498_s17, %s1777_s17   ;;  %s1453_s16 = sphi %s1496_s16, %s1776_s16   ;;  %s1449_s15 = sphi %s1494_s15, %s1775_s15  }
   0x4   : > { %s1519_s21 = sadd.s32 1, %s1461_s18   ;;  %s113_s22 = sadd.s32 1, %s1457_s17 }
   0x5   : > { %s110_s23 = ssub.s32 %s1461_s18, %s1519_s21  ;;  %p123_p0 = scmp.ne.s32.totalorder %s1457_s17, %s1453_s16 }
   0x6   : > { %p111_p1 = scmp.eq.s32.totalorder %s110_s23, 0  ;;  %p124_p2 = scmp.eq.s32.totalorder %s1515_s19, 1 }
   0x7   : > { %p129_p3 = scmp.ne.s32.totalorder %s1453_s16, %s1449_s15  ;;  %p130_p4 = scmp.eq.s32.totalorder %s1192_s20, 1 }
   0x8   : > { %s1530_s24 = scalar_select %p111_p1, %s1457_s17, %s113_s22  }
   0x9   : > { %p1532_p5 = por %p124_p2, %p123_p0  ;;  %p1536_p6 = por %p130_p4, %p129_p3 }
   0xa   : > { %p1195_p7 = scmp.ge.s32.totalorder %s1461_s18, 1  ;;  %p164_p8 = scmp.lt.s32.totalorder %s1461_s18, 3 }
   0xc   : > { %p165_p9 = pnand %p1195_p7, %p164_p8 }
   0xd   : > { %p189_p10 = scmp.lt.s32.totalorder (!%p165_p9), %s1515_s19, 1  ;;  %s1465_s13 = smov (!%p165_p9), 96  }
   0xe   : > { %168 = sbr.rel (%p165_p9) target bundleno = 1822 (0x71e), region = 36  ;;  %s1466_s14 = smov (!%p165_p9), 64  }
   0xf   : > { %s1467_s20 = smov (!%p165_p9), 32  }
  0x13   : > { %v204_v0 = vld [vmem:[%s1769_s1 + $0x50] sm:$0xff]  ;;  %v203_v1 = vld [vmem:[%s1769_s1 + $0x48] sm:$0xff]  ;;  %v201_v2 = vld [vmem:[%s1769_s1 + $0x38] sm:$0xff]  ;;  %v1463_v4 = vmov 0.0   ;;  %s190_s11 = scalar_select %p189_p10, %s1515_s19, 1  ;;  %vm206_vm0 = vcmask 261120  }
  0x14   : > { %234 = vmatprep.subr.mxu1 %v204_v0  ;;  %v200_v3 = vld [vmem:[%s1769_s1 + $0x30] sm:$0xff]  ;;  %274 = vmatprep.mubr.f32.mxu1 %v1463_v4  ;;  %v198_v5 = vld [vmem:[%s1769_s1 + $0x20] sm:$0xff]  ;;  %v197_v6 = vld [vmem:[%s1769_s1 + $0x18] sm:$0xff]  ;;  %vm1464_vm1 = vmmov 0   ;;  %vm427_vm2 = vcmask 64512   ;;  %vm1021_vm3 = vcmask 523264  }
  0x15   : > { %235 = vmatpush1.msra.mxu1 %v203_v1  ;;  %1286 = vmatprep.subr.mxu0 %v1463_v4  ;;  %v195_v7 = vld [vmem:[%s1769_s1 + $0x8] sm:$0xff]  ;;  %s1197_s22 = sshll.u32 %s190_s11, 3  ;;  %v194_v8 = vld [vmem:[%s1769_s1] sm:$0xff]  ;;  %v205_v10 = vld [vmem:[%s1769_s1 + $0x58] sm:$0xff]  ;;  %vm1023_vm4 = vcmask 785408  }
  0x16   : > { %236 = vmatprep.subr.mxu1 %v201_v2  ;;  %s192_s30 = scalar_lea.vmem %s1768_s0, %s1197_s22  ;;  %v202_v11 = vld [vmem:[%s1769_s1 + $0x40] sm:$0xff]  ;;  %v199_v12 = vld [vmem:[%s1769_s1 + $0x28] sm:$0xff]  ;;  %v196_v13 = vld [vmem:[%s1769_s1 + $0x10] sm:$0xff]  ;;  %1288 = vmatprep.mubr.msk.f32.mxu0 %vm1464_vm1, %v1463_v4 }
  0x17   : > { %237 = vmatpush1.msra.mxu1 %v200_v3  ;;  %v193_v9 = vld [vmem:[%s192_s30] sm:$0xff] }
  0x18   : > { %238 = vmatprep.subr.mxu1 %v198_v5 }
  0x19   : > { %239 = vmatpush1.msra.mxu1 %v197_v6 }
  0x1a   : > { %240 = vmatprep.subr.mxu1 %v195_v7 }
  0x1b   : > { %241 = vmatpush1.msra.mxu1 %v194_v8 }
  0x1c   : > { %1198 = vmatmul.mubr.msk.f32.vlgmr.msra.gmra.mxu1 %vm206_vm0, %v193_v9  ;;  %1255 = vmatprep.subr.mxu1 %v1463_v4 }
  0x1d   : > { %1256 = vmatpush3.msra.mxu1 %v205_v10  ;;  %1263 = vmatprep.mubr.msk.f32.mxu1 %vm1464_vm1, %v1463_v4  ;;  %v1040_v10 = vld [vmem:[%s1770_s2 + $0x78] sm:$0xff] }
  0x1e   : > { %1257 = vmatprep.subr.mxu1 %v1463_v4 }
  0x1f   : > { %1258 = vmatpush3.msra.mxu1 %v202_v11  ;;  %v1039_v11 = vld [vmem:[%s1770_s2 + $0x70] sm:$0xff] }
  0x20   : > { %1259 = vmatprep.subr.mxu1 %v1463_v4 }
  0x21   : > { %1260 = vmatpush3.msra.mxu1 %v199_v12  ;;  %v1038_v12 = vld [vmem:[%s1770_s2 + $0x68] sm:$0xff] }
  0x22   : > { %1261 = vmatprep.subr.mxu1 %v1463_v4 }
  0x23   : > { %1262 = vmatpush3.msra.mxu1 %v196_v13  ;;  %v1037_v13 = vld [vmem:[%s1770_s2 + $0x60] sm:$0xff] }
  0x24   : > { %1264 = vmatmul.mubr.msk.f32.vlgmr.msra.gmra.mxu1 %vm206_vm0, %v193_v9  ;;  %1266 = vmatprep.subr.mxu1 %v1463_v4 }
  0x25   : > { %1268 = vmatprep.mubr.msk.f32.mxu1 %vm1464_vm1, %v1463_v4 }
  0xdc   : > { %v276_v14 = vpop.f32.mrf.mxu1 }
  0xde   : > { %v278_v15 = vpop.f32.mrf.mxu1 }
  0xdf   : > { %514 = vrot.lane.b32.xlu1 %v278_v15, %s1465_s13  ;;  %1267 = vmatpush3.xpose.msk.msra.mxu1 %vm206_vm0, %v278_v15 }
  0xe0   : > { %1271 = vmatprep.subr.mxu1 %v1463_v4 }
  0xe2   : > { %1269 = vmatmul.mubr.msk.f32.vlgmr.msra.gmra.mxu1 %vm206_vm0, %v276_v14 }
  0xe3   : > { %512 = vrot.lane.b32.xlu1 %v276_v14, %s1465_s13  ;;  %1273 = vmatprep.mubr.msk.f32.mxu1 %vm1464_vm1, %v1463_v4 }
  0xe4   : > { %v1608_v16 = vpop.f32.mrf.mxu1 }
  0xe5   : > { %1272 = vmatpush3.msra.mxu1 %v1608_v16 }
  0xe6   : > { %v1265_v17 = vpop.f32.mrf.mxu1  ;;  %1276 = vmatprep.subr.mxu1 %v1463_v4 }
  0xe7   : > { %678 = vrot.lane.b32.xlu1 %v276_v14, %s1466_s14  ;;  %v1033_v17 = vld [vmem:[%s1770_s2 + $0x40] sm:$0xff] }
  0xeb   : > { %845 = vrot.lane.b32.xlu1 %v278_v15, %s1467_s20 }
  0xef   : > { %843 = vrot.lane.b32.xlu1 %v276_v14, %s1467_s20  ;;  %v1036_v14 = vld [vmem:[%s1770_s2 + $0x58] sm:$0xff] }
 0x151   : > { %v515_v26 = vpop.permute.xlu1 %514 }
 0x155   : > { %v513_v27 = vpop.permute.xlu1 %512 }
 0x159   : > { %v679_v28 = vpop.permute.xlu1 %678 }
 0x15d   : > { %v846_v31 = vpop.permute.xlu1 %845 }
 0x161   : > { %v844_v32 = vpop.permute.xlu1 %843 }
 0x1a2   : > { %v423_v18 = vpop.f32.mrf.mxu1 }
 0x1a3   : > { %v428_v19 = vsel %vm427_vm2, %v423_v18, -inf }
 0x1a4   : > { %429 = vmax.xlane.f32.xlu0 %v428_v19  ;;  %v1270_v20 = vpop.f32.mrf.mxu1  ;;  %v1031_v19 = vld [vmem:[%s1770_s2 + $0x30] sm:$0xff] }
 0x1a5   : > { %v1030_v20 = vld [vmem:[%s1770_s2 + $0x28] sm:$0xff] }
 0x22d   : > { %v430_v21 = vpop.xlane.xlu0 %429 }
 0x22e   : > { %v431_v22 = vsub.f32 %v423_v18, %v430_v21  ;;  %v1032_v18 = vld [vmem:[%s1770_s2 + $0x38] sm:$0xff]  ;;  %v1029_v21 = vld [vmem:[%s1770_s2 + $0x20] sm:$0xff] }
 0x230   : > { %v432_v23 = vmul.f32 1.442695, %v431_v22  ;;  %v1028_v22 = vld [vmem:[%s1770_s2 + $0x18] sm:$0xff] }
 0x232   : > { %1385 = vpow2.f32 %v432_v23  ;;  %v1027_v23 = vld [vmem:[%s1770_s2 + $0x10] sm:$0xff] }
 0x23f   : > { %v1386_v24 = vpop.eup %1385 }
 0x240   : > { %v434_v25 = vsel %vm427_vm2, %v1386_v24, 0.0 }
 0x241   : > { %435 = vadd.xlane.f32.xlu0 %v434_v25  ;;  %v1025_v25 = vld [vmem:[%s1770_s2] sm:$0xff] }
 0x257   : > { %680 = vrot.lane.b32.xlu0 %v278_v15, %s1466_s14  ;;  %v1035_v15 = vld [vmem:[%s1770_s2 + $0x50] sm:$0xff] }
 0x2ca   : > { %v436_v29 = vpop.xlane.xlu0 %435 }
 0x2cb   : > { %1387 = vrcp.f32 %v436_v29 }
 0x2ce   : > { %v681_v30 = vpop.permute.xlu0 %680 }
 0x2cf   : > { %1287 = vmatpush3.xpose.msk.msra.mxu0 %vm206_vm0, %v681_v30 }
 0x2d0   : > { %1296 = vmatprep.subr.mxu0 %v1463_v4 }
 0x2d2   : > { %1289 = vmatmul.mubr.msk.f32.vlgmr.msra.gmra.mxu0 %vm206_vm0, %v679_v28 }
 0x2d3   : > { %1297 = vmatpush3.xpose.msk.msra.mxu0 %vm206_vm0, %v846_v31  ;;  %1298 = vmatprep.mubr.msk.f32.mxu0 %vm1464_vm1, %v1463_v4 }
 0x2d4   : > { %1306 = vmatprep.subr.mxu0 %v1463_v4 }
 0x2d6   : > { %1299 = vmatmul.mubr.msk.f32.vlgmr.msra.gmra.mxu0 %vm206_vm0, %v844_v32 }
 0x2d7   : > { %1338 = vmatprep.mubr.msk.f32.mxu0 %vm1464_vm1, %v1463_v4  ;;  %1307 = vmatpush3.msra.mxu0 %v1040_v10 }
 0x2d8   : > { %v1388_v33 = vpop.eup %1387  ;;  %1308 = vmatprep.subr.mxu0 %v1463_v4 }
 0x2d9   : > { %v438_v34 = vmul.f32 %v1388_v33, %v1386_v24  ;;  %1309 = vmatpush3.msra.mxu0 %v1039_v11  ;;  %v1026_v24 = vld [vmem:[%s1770_s2 + $0x8] sm:$0xff] }
 0x2da   : > { %1310 = vmatprep.subr.mxu0 %v1463_v4 }
 0x2db   : > { %1274 = vmatmul.mubr.msk.f32.vlgmr.msra.gmra.mxu1 %vm427_vm2, %v438_v34  ;;  %1311 = vmatpush3.msra.mxu0 %v1038_v12 }
 0x2dc   : > { %1277 = vmatpush3.xpose.msk.msra.mxu1 %vm206_vm0, %v515_v26  ;;  %1278 = vmatprep.mubr.msk.f32.mxu1 %vm1464_vm1, %v1463_v4 }
 0x2dd   : > { %1281 = vmatprep.subr.mxu1 %v1463_v4  ;;  %1312 = vmatprep.subr.mxu0 %v1463_v4 }
 0x2de   : > { %1313 = vmatpush3.msra.mxu0 %v1037_v13 }
 0x2df   : > { %1279 = vmatmul.mubr.msk.f32.vlgmr.msra.gmra.mxu1 %vm206_vm0, %v513_v27  ;;  %1314 = vmatprep.subr.mxu0 %v1463_v4 }
 0x2e0   : > { %1283 = vmatprep.mubr.msk.f32.mxu1 %vm1464_vm1, %v1463_v4  ;;  %1315 = vmatpush3.msra.mxu0 %v1036_v14 }
 0x2e1   : > { %1316 = vmatprep.subr.mxu0 %v1463_v4 }
 0x2e2   : > { %1317 = vmatpush3.msra.mxu0 %v1035_v15 }
 0x2e3   : > { %1318 = vmatprep.subr.mxu0 %v1463_v4 }
 0x392   : > { %v752_v35 = vpop.f32.mrf.mxu0 }
 0x393   : > { %v756_v36 = vsel %vm427_vm2, %v752_v35, -inf }
 0x394   : > { %757 = vmax.xlane.f32.xlu0 %v756_v36  ;;  %v1290_v37 = vpop.f32.mrf.mxu0 }
 0x395   : > { %v1212_v37 = vld [vmem:[%s1771_s3] ss:$0 sm:$0xff] }
 0x396   : > { %v917_v38 = vpop.f32.mrf.mxu0 }
 0x397   : > { %v921_v45 = vsel %vm427_vm2, %v917_v38, -inf }
 0x398   : > { %v1300_v39 = vpop.f32.mrf.mxu0 }
 0x39b   : > { %v1634_v40 = vpop.f32.mrf.mxu1 }
 0x39d   : > { %v1275_v41 = vpop.f32.mrf.mxu1 }
 0x39f   : > { %v586_v42 = vpop.f32.mrf.mxu1 }
 0x3a0   : > { %v590_v43 = vsel %vm427_vm2, %v586_v42, -inf }
 0x3a1   : > { %591 = vmax.xlane.f32.xlu1 %v590_v43  ;;  %v1280_v44 = vpop.f32.mrf.mxu1 }
 0x3a5   : > { %922 = vmax.xlane.f32.xlu1 %v921_v45 }
 0x41d   : > { %v758_v46 = vpop.xlane.xlu0 %757 }
 0x41e   : > { %v759_v47 = vsub.f32 %v752_v35, %v758_v46 }
 0x420   : > { %v760_v48 = vmul.f32 1.442695, %v759_v47 }
 0x422   : > { %1389 = vpow2.f32 %v760_v48 }
 0x42a   : > { %v592_v49 = vpop.xlane.xlu1 %591 }
 0x42b   : > { %v593_v57 = vsub.f32 %v586_v42, %v592_v49 }
 0x42d   : > { %v594_v58 = vmul.f32 1.442695, %v593_v57 }
 0x42e   : > { %v923_v50 = vpop.xlane.xlu1 %922 }
 0x42f   : > { %v1390_v51 = vpop.eup %1389  ;;  %v924_v52 = vsub.f32 %v917_v38, %v923_v50 }
 0x430   : > { %v762_v53 = vsel %vm427_vm2, %v1390_v51, 0.0 }
 0x431   : > { %v925_v54 = vmul.f32 1.442695, %v924_v52  ;;  %763 = vadd.xlane.f32.xlu0 %v762_v53 }
 0x433   : > { %1391 = vpow2.f32 %v925_v54 }
 0x434   : > { %1393 = vpow2.f32 %v594_v58 }
 0x440   : > { %v1392_v55 = vpop.eup %1391 }
 0x441   : > { %v927_v56 = vsel %vm427_vm2, %v1392_v55, 0.0  ;;  %v1394_v59 = vpop.eup %1393 }
 0x442   : > { %928 = vadd.xlane.f32.xlu1 %v927_v56  ;;  %v596_v60 = vsel %vm427_vm2, %v1394_v59, 0.0 }
 0x447   : > { %602 = vrot.lane.b32.xlu0 %v1608_v16, %s1465_s13 }
 0x453   : > { %767 = vrot.lane.b32.xlu1 %v1608_v16, %s1466_s14 }
 0x477   : > { %597 = vadd.xlane.f32.xlu1 %v596_v60 }
 0x488   : > { %932 = vrot.lane.b32.xlu1 %v1608_v16, %s1467_s20  ;;  %v1034_v16 = vld [vmem:[%s1770_s2 + $0x48] sm:$0xff] }
 0x489   : > { %1319 = vmatpush3.msra.mxu0 %v1034_v16 }
 0x48a   : > { %1320 = vmatprep.subr.mxu0 %v1463_v4 }
 0x48b   : > { %1321 = vmatpush3.msra.mxu0 %v1033_v17 }
 0x48c   : > { %1322 = vmatprep.subr.mxu0 %v1463_v4 }
 0x48d   : > { %1323 = vmatpush3.msra.mxu0 %v1032_v18 }
 0x48e   : > { %1324 = vmatprep.subr.mxu0 %v1463_v4 }
 0x48f   : > { %1325 = vmatpush3.msra.mxu0 %v1031_v19 }
 0x490   : > { %1326 = vmatprep.subr.mxu0 %v1463_v4 }
 0x491   : > { %1327 = vmatpush3.msra.mxu0 %v1030_v20 }
 0x492   : > { %1328 = vmatprep.subr.mxu0 %v1463_v4 }
 0x493   : > { %1329 = vmatpush3.msra.mxu0 %v1029_v21 }
 0x494   : > { %1330 = vmatprep.subr.mxu0 %v1463_v4 }
 0x495   : > { %1331 = vmatpush3.msra.mxu0 %v1028_v22 }
 0x496   : > { %1332 = vmatprep.subr.mxu0 %v1463_v4 }
 0x497   : > { %1333 = vmatpush3.msra.mxu0 %v1027_v23 }
 0x498   : > { %1334 = vmatprep.subr.mxu0 %v1463_v4 }
 0x499   : > { %1335 = vmatpush3.msra.mxu0 %v1026_v24 }
 0x49a   : > { %1336 = vmatprep.subr.mxu0 %v1463_v4 }
 0x49b   : > { %1337 = vmatpush3.msra.mxu0 %v1025_v25 }
 0x4ba   : > { %v764_v61 = vpop.xlane.xlu0 %763 }
 0x4be   : > { %v603_v62 = vpop.permute.xlu0 %602 }
 0x4bf   : > { %1282 = vmatpush3.msra.mxu1 %v603_v62 }
 0x4c0   : > { %1291 = vmatprep.subr.mxu1 %v1463_v4 }
 0x4cb   : > { %v929_v63 = vpop.xlane.xlu1 %928 }
 0x4cf   : > { %v768_v0 = vpop.permute.xlu1 %767 }
 0x500   : > { %v598_v1 = vpop.xlane.xlu1 %597 }
 0x501   : > { %1395 = vrcp.f32 %v598_v1 }
 0x502   : > { %1397 = vrcp.f32 %v764_v61 }
 0x503   : > { %1399 = vrcp.f32 %v929_v63 }
 0x504   : > { %v933_v8 = vpop.permute.xlu1 %932 }
 0x50e   : > { %v1396_v2 = vpop.eup %1395 }
 0x50f   : > { %v600_v3 = vmul.f32 %v1396_v2, %v1394_v59  ;;  %v1398_v5 = vpop.eup %1397 }
 0x510   : > { %v766_v6 = vmul.f32 %v1398_v5, %v1390_v51  ;;  %v1400_v7 = vpop.eup %1399 }
 0x511   : > { %1284 = vmatmul.mubr.msk.f32.vlgmr.msra.gmra.mxu1 %vm427_vm2, %v600_v3  ;;  %v931_v9 = vmul.f32 %v1400_v7, %v1392_v55 }
 0x512   : > { %1292 = vmatpush3.msra.mxu1 %v768_v0  ;;  %1293 = vmatprep.mubr.msk.f32.mxu1 %vm1464_vm1, %v1463_v4 }
 0x513   : > { %1301 = vmatprep.subr.mxu1 %v1463_v4 }
 0x515   : > { %1294 = vmatmul.mubr.msk.f32.vlgmr.msra.gmra.mxu1 %vm427_vm2, %v766_v6 }
 0x516   : > { %1302 = vmatpush3.msra.mxu1 %v933_v8  ;;  %1303 = vmatprep.mubr.msk.f32.mxu1 %vm1464_vm1, %v1463_v4 }
 0x519   : > { %1304 = vmatmul.mubr.msk.f32.vlgmr.msra.gmra.mxu1 %vm427_vm2, %v931_v9 }
 0x5d1   : > { %v674_v26 = vpop.f32.mrf.mxu1 }
 0x5d2   : > { %1009 = vrot.lane.b32.xlu0 %v674_v26, %s1467_s20  ;;  %s186_s20 = sand.u32 1, %s1453_s16  }
 0x5d3   : > { %v1285_v27 = vpop.f32.mrf.mxu1  ;;  %s1120_s10 = scalar_lea.sflag [#allocation3], %s186_s20 }
 0x5d5   : > { %v839_v28 = vpop.f32.mrf.mxu1 }
 0x5d6   : > { %1013 = vrot.lane.b32.xlu1 %v839_v28, %s1466_s14  ;;  %s1196_s14 = sshll.u32 %s186_s20, 3 }
 0x5d7   : > { %v1295_v29 = vpop.f32.mrf.mxu1  ;;  %s188_s5 = scalar_lea.vmem [#allocation2], %s1196_s14 }
 0x5d8   : > { %s1133_s6 = sshll.u32 %s188_s5, 4  ;;  %s1134_s6 = int_to_ptr.vmem [resolvable:$true] %s1133_s6 }
 0x5d9   : > { %v1004_v30 = vpop.f32.mrf.mxu1  ;;  %s1401_s11 = scalar_lea.vmem %s1134_s6, 128 }
 0x5da   : > { %1017 = vrot.lane.b32.xlu0 %v1004_v30, %s1465_s13  ;;  %s1214_s13 = sshll.u32 %s1515_s19, 7  ;;  %p1402_p11 = scmp.ne.s32.totalorder %s1134_s6, %s1401_s11 }
 0x5db   : > { %v1305_v31 = vpop.f32.mrf.mxu1  ;;  %s1732_s9 = scalar_lea.hbm %s1772_s4, %s1214_s13  ;;  %s1468_s19 = smov [#allocation2]  }
 0x5dc   : > { %p1403_p12 = pnand %p1402_p11, %p1532_p5  ;;  %s1405_s12 = sshll.u32 %s1468_s19, 4  ;;  %s1406_s12 = int_to_ptr.vmem [resolvable:$false] %s1405_s12 }
 0x5dd   : > { %s1407_s22 = scalar_lea.vmem %s1406_s12, 256  ;;  %p1408_p0 = scmp.lt.s32.totalorder %s1134_s6, %s1406_s12 }
 0x5de   : > { %p1404_p13 = pneg %p1403_p12  ;;  %p1409_p1 = scmp.lt.s32.totalorder %s1407_s22, %s1401_s11 }
 0x5e0   : > { %p1410_p2 = por %p1409_p1, %p1408_p0 }
 0x5e2   : > { %p1411_p3 = pnand %p1410_p2, %p1404_p13 }
 0x644   : > { %v1010_v4 = vpop.permute.xlu0 %1009 }
 0x645   : > { %v1020_v33 = vsel %vm206_vm0, %v1634_v40, %v1010_v4 }
 0x648   : > { %v1014_v32 = vpop.permute.xlu1 %1013 }
 0x649   : > { %v1022_v34 = vsel %vm1021_vm3, %v1020_v33, %v1014_v32 }
 0x64c   : > { %v1018_v35 = vpop.permute.xlu0 %1017 }
 0x64d   : > { %v1024_v36 = vsel %vm1023_vm4, %v1022_v34, %v1018_v35 }
 0x64e   : > { %1339 = vmatmul.mubr.f32.vlgmr.msra.gmra.mxu0 %v1024_v36 }
 0x70e   : > { %v1114_v38 = vpop.f32.mrf.mxu0 }
 0x70f   : > { %v1115_v39 = vadd.f32 %v1212_v37, %v1114_v38 }
 0x710   : > { %v1340_v40 = vpop.f32.mrf.mxu0 }
 0x711   : > { %1118 = vst.msk [vmem:[%s188_s5] sm:$0xff] %vm206_vm0, %v1115_v39 }
 0x712   : > { %1414 = shalt.err (!%p1411_p3)
}
 0x713   : > { %s1415_s23 = scalar_lea.hbm %s1732_s9, 128  ;;  %s1419_s20 = scalar_lea.hbm %s1772_s4, 256 }
 0x714   : > { %p1416_p4 = scmp.ne.s32.totalorder %s1732_s9, %s1415_s23  ;;  %p1420_p9 = scmp.lt.s32.totalorder %s1732_s9, %s1772_s4 }
 0x715   : > { %p1421_p10 = scmp.lt.s32.totalorder %s1419_s20, %s1415_s23 }
 0x716   : > { %p1417_p7 = pnand %p1416_p4, %p1532_p5 }
 0x717   : > { %p1422_p11 = por %p1421_p10, %p1420_p9 }
 0x718   : > { %p1418_p8 = pneg %p1417_p7 }
 0x71a   : > { %p1423_p12 = pnand %p1422_p11, %p1418_p8 }
 0x71c   : > { %1426 = shalt.err (!%p1423_p12)
}
 0x71d   : > { %1341 = dma.vmem_to_hbm [thread:$0]  (%p1532_p5), %s1134_s6, 128, %s1732_s9, %s1120_s10  }
 0x71e PF: > { %p1347_p13 = scmp.ge.s32.totalorder %s1461_s18, 2  ;;  %s1145_s30 = sand.u32 1, %s1449_s15  }
 0x71f   : > { %s1146_s13 = scalar_lea.sflag [#allocation3], %s1145_s30 }
 0x720   : > { %p1344_p0 = pnand %p1347_p13, %p1536_p6 }
 0x722   : > { %p1345_p1 = pneg %p1344_p0 }
 0x724   : > { %1444 = dma.done.wait (%p1345_p1), %s1146_s13, 128  }
 0x725   : > { %1446 = vsyncadd (%p1345_p1), %s1146_s13, 4294967168  ;;  %p14_p2 = scmp.ge.s32.totalorder %s1519_s21, 4   ;;  %s1775_s15 = smov %s1453_s16 }
 0x726   : > { %s1776_s16 = smov %s1457_s17  ;;  %s1777_s17 = smov %s1530_s24 }
 0x727   : > { %s1778_s18 = smov %s1519_s21  ;;  %16 = sbr.rel (!%p14_p2) target bundleno = 3 (0x3), region = 71 }
 0x72c   :  { %1151 = vsyncpa [#allocation3], 1 }
 0x72d   :  { %1153 = vsyncpa [#allocation3 + $0x1], 1 }

</bundles_post_ra>
